<compile_context>
chip_gen: v5e
topology: v5e:2x2
jax: 0.10.0
libtpu: 0.0.40
codegen_flags: <defaults>
</compile_context>

<pallas_src>
import functools

import jax
import jax.numpy as jnp
from jax.experimental import pallas as pl
from jax.experimental.pallas import tpu as pltpu


def _round_up(x: int, m: int) -> int:
    return (x + m - 1) // m * m


def _tbnn_kernel(nlayers: int, *refs):
    """MLP (ReLU hidden, identity final) + MXU tensor-basis contraction.

    refs = (inv_ref, t_ref, r_ref, gemb_ref, semb_ref,
            w0, b0, ..., w{L-1}, b{L-1}, out_ref)
      inv_ref : (TILE_N, input_dim)
      t_ref   : (TILE_N, 90)   flattened (10, 9) basis, k-major groups of 9
      r_ref   : (10, 90)       repeat-each-g-lane-9x constant
      gemb_ref: (10, 19)       embeds g into output lanes 0..9
      semb_ref: (90, 19)       group-sums product into output lanes 10..18
      out_ref : (TILE_N, 19)   [ g (10 lanes) | b (9 lanes) ]
    """
    inv_ref, t_ref, r_ref, gemb_ref, semb_ref = refs[:5]
    wb_refs = refs[5:5 + 2 * nlayers]
    out_ref = refs[5 + 2 * nlayers]

    # ---- MLP chain (tiny widths; the kernel is HBM-bound, not MXU-bound) ----
    x = inv_ref[...].astype(jnp.float32)
    for i in range(nlayers):
        w = wb_refs[2 * i][...].astype(jnp.float32)
        b = wb_refs[2 * i + 1][...].astype(jnp.float32)
        x = jnp.dot(x, w, preferred_element_type=jnp.float32) + b
        if i < nlayers - 1:
            x = jnp.maximum(x, 0.0)  # hidden activation: ReLU (module default)
        # final layer activation: identity (module default)
    # TODO(synk): only the default activations (ReLU hidden / identity final)
    # are implemented in-kernel; arbitrary Python callables are not translated.
    g = x  # (TILE_N, 10)

    # ---- tensor-basis contraction, MXU form: b = ((g @ R) * t) @ S ----
    g_rep = jnp.dot(g, r_ref[...], preferred_element_type=jnp.float32)   # (TILE_N, 90)
    prod = g_rep * t_ref[...].astype(jnp.float32)                        # lane-dense VPU
    out = (jnp.dot(g, gemb_ref[...], preferred_element_type=jnp.float32)
           + jnp.dot(prod, semb_ref[...], preferred_element_type=jnp.float32))
    out_ref[...] = out.astype(out_ref.dtype)                             # (TILE_N, 19)


def tbnn_forward(inv, t, weights, biases, *, tile_n=4096):
    """Pallas forward for TBNN_generic.

    inv:     (N, input_dim) float32
    t:       (N, 10, 9)     float32
    weights: list of (in_i, out_i) float32 (transposed vs. torch Linear.weight)
    biases:  list of (out_i,)       float32
    Returns (b, g_expanded):
      b          = sum_k g[:, k] * t[:, k, :]  -> (N, 9)
      g_expanded                               -> (N, 10, 9)
    """
    N, input_dim = inv.shape
    assert t.shape == (N, 10, 9)
    nlayers = len(weights)
    assert nlayers == len(biases)

    # Shape checks: weights must be pre-transposed (in, out) vs torch's (out, in).
    dims = [input_dim]
    for li, (w, b) in enumerate(zip(weights, biases)):
        assert w.ndim == 2 and w.shape[0] == dims[-1], (
            f"layer {li}: expected weight (in={dims[-1]}, out), got {w.shape}; "
            "weights must be transposed relative to torch Linear.weight")
        assert b.shape == (w.shape[1],), f"layer {li}: bad bias shape {b.shape}"
        dims.append(w.shape[1])
    assert dims[-1] == 10, "final layer must output 10 basis coefficients"

    # Contiguous 360 B/row stream for the basis tensors.
    t_flat = t.reshape(N, 90)

    # Constant contraction matrices (VMEM-resident across grid steps).
    r_mat = jnp.repeat(jnp.eye(10, dtype=jnp.float32), 9, axis=1)          # (10, 90)
    gemb = jnp.eye(10, 19, dtype=jnp.float32)                               # (10, 19)
    semb = jnp.pad(jnp.tile(jnp.eye(9, dtype=jnp.float32), (10, 1)),
                   ((0, 0), (10, 0)))                                       # (90, 19)

    # Batch tile: multiple of 8 sublanes; only pad N when it doesn't divide.
    tile_n = max(8, min(tile_n, _round_up(N, 8)))
    tile_n = _round_up(tile_n, 8)
    n_pad = _round_up(N, tile_n)
    if n_pad != N:
        inv = jnp.pad(inv, ((0, n_pad - N), (0, 0)))
        t_flat = jnp.pad(t_flat, ((0, n_pad - N), (0, 0)))

    grid = (n_pad // tile_n,)

    in_specs = [
        pl.BlockSpec((tile_n, input_dim), lambda i: (i, 0)),
        pl.BlockSpec((tile_n, 90), lambda i: (i, 0)),
        pl.BlockSpec(r_mat.shape, lambda i: (0, 0)),
        pl.BlockSpec(gemb.shape, lambda i: (0, 0)),
        pl.BlockSpec(semb.shape, lambda i: (0, 0)),
    ]
    wb_args = []
    for w, b in zip(weights, biases):
        b2 = b.reshape(1, -1)
        # Constant block index -> weights DMA'd once, stay resident in VMEM.
        in_specs.append(pl.BlockSpec(w.shape, lambda i: (0, 0)))
        in_specs.append(pl.BlockSpec(b2.shape, lambda i: (0, 0)))
        wb_args.extend([w, b2])

    out_specs = pl.BlockSpec((tile_n, 19), lambda i: (i, 0))
    out_shape = jax.ShapeDtypeStruct((n_pad, 19), inv.dtype)

    # VMEM budget: every sub-128-lane f32 slab pads to 128 lanes (512 B/row).
    # 3 pipelined slabs (inv, t, out) double-buffered + ~5 in-kernel f32
    # temporaries live at once, plus a small margin for weights/constants.
    vmem_bytes = tile_n * 128 * 4 * (3 * 2 + 5) + (2 << 20)
    vmem_bytes = min(max(vmem_bytes, 32 << 20), 56 << 20)  # fits v7x's 64 MiB

    # On v7x use CORE_PARALLEL so the batch axis actually shards across both
    # TensorCores; v5e/v6e have a single TC.
    kind = jax.devices()[0].device_kind.lower()
    dim_sem = (pltpu.CORE_PARALLEL,) if "7" in kind else (pltpu.PARALLEL,)

    mlp_flops_per_row = sum(2 * w.shape[0] * w.shape[1] for w in weights)
    contr_flops_per_row = 2 * 10 * 90 + 90 + 2 * 90 * 19 + 2 * 10 * 19
    cost = pl.CostEstimate(
        flops=N * (mlp_flops_per_row + contr_flops_per_row),
        transcendentals=0,
        bytes_accessed=N * 4 * (input_dim + 90 + 19)
        + sum(4 * (w.size + b.size) for w, b in zip(weights, biases)),
    )

    out = pl.pallas_call(
        functools.partial(_tbnn_kernel, nlayers),
        grid=grid,
        in_specs=in_specs,
        out_specs=out_specs,
        out_shape=out_shape,
        compiler_params=pltpu.CompilerParams(
            dimension_semantics=dim_sem,
            vmem_limit_bytes=vmem_bytes),
        cost_estimate=cost,
    )(inv, t_flat, r_mat, gemb, semb, *wb_args)

    out = out[:N] if n_pad != N else out
    g = out[:, :10]
    bsum = out[:, 10:19]
    # Expanded g is a pure broadcast of 10 values into 90 -> do it in plain JAX
    # outside the kernel instead of writing 360 B/row from the kernel.
    g_expanded = jnp.broadcast_to(g[:, :, None], (N, 10, 9))
    return bsum, g_expanded


def _tbnn_reference(inv, t, weights, biases):
    """Pure-JAX reference identical to the PyTorch forward."""
    x = inv
    n = len(weights)
    for i, (w, b) in enumerate(zip(weights, biases)):
        x = x @ w + b
        if i < n - 1:
            x = jnp.maximum(x, 0.0)
    g = jnp.broadcast_to(x[:, :, None], (x.shape[0], 10, 9))
    return (g * t).sum(axis=1), g


if __name__ == "__main__":
    key = jax.random.PRNGKey(0)
    layersizes = [5, 32, 32, 10]   # input_dim=5, two hidden of 32, output 10
    N = 64                         # small batch of sample points

    nlayers = len(layersizes) - 1
    keys = jax.random.split(key, 2 + 2 * nlayers)
    inv = jax.random.normal(keys[0], (N, layersizes[0]), dtype=jnp.float32)
    t = jax.random.normal(keys[1], (N, 10, 9), dtype=jnp.float32)

    weights, biases = [], []
    for li in range(nlayers):
        fan_in, fan_out = layersizes[li], layersizes[li + 1]
        bound = 1.0 / (fan_in ** 0.5)
        weights.append(jax.random.uniform(
            keys[2 + 2 * li], (fan_in, fan_out), jnp.float32, -bound, bound))
        biases.append(jax.random.uniform(
            keys[3 + 2 * li], (fan_out,), jnp.float32, -bound, bound))

    b_out, g_out = tbnn_forward(inv, t, weights, biases)
    (b_out, g_out) = jax.block_until_ready((b_out, g_out))

    b_ref, g_ref = _tbnn_reference(inv, t, weights, biases)
    assert b_out.shape == (N, 9) and g_out.shape == (N, 10, 9)
    assert jnp.allclose(b_out, b_ref, atol=1e-4, rtol=1e-4), "b mismatch vs reference"
    assert jnp.allclose(g_out, g_ref, atol=1e-4, rtol=1e-4), "g mismatch vs reference"

    print("KERNEL_OK")
</pallas_src>

<mosaic_0001>
module attributes {stable_mosaic.version = 11 : i64} {
  func.func @_tbnn_kernel(%arg0: i32, %arg1: memref<64x5xf32, #tpu.memory_space<vmem>>, %arg2: memref<64x90xf32, #tpu.memory_space<vmem>>, %arg3: memref<10x90xf32, #tpu.memory_space<vmem>>, %arg4: memref<10x19xf32, #tpu.memory_space<vmem>>, %arg5: memref<90x19xf32, #tpu.memory_space<vmem>>, %arg6: memref<5x32xf32, #tpu.memory_space<vmem>>, %arg7: memref<1x32xf32, #tpu.memory_space<vmem>>, %arg8: memref<32x32xf32, #tpu.memory_space<vmem>>, %arg9: memref<1x32xf32, #tpu.memory_space<vmem>>, %arg10: memref<32x10xf32, #tpu.memory_space<vmem>>, %arg11: memref<1x10xf32, #tpu.memory_space<vmem>>, %arg12: memref<64x19xf32, #tpu.memory_space<vmem>>) attributes {dimension_semantics = [#tpu.dimension_semantics<parallel>], iteration_bounds = array<i64: 1>, scalar_prefetch = 0 : i64, scratch_operands = 0 : i64, tpu.core_type = #tpu.core_type<tc>, window_params = [{transform_indices = @transform_0, window_bounds = array<i64: 64, 5>}, {transform_indices = @transform_1, window_bounds = array<i64: 64, 90>}, {pipeline_mode = #tpu.pipeline_mode<synchronous>, transform_indices = @transform_2, window_bounds = array<i64: 10, 90>}, {pipeline_mode = #tpu.pipeline_mode<synchronous>, transform_indices = @transform_3, window_bounds = array<i64: 10, 19>}, {pipeline_mode = #tpu.pipeline_mode<synchronous>, transform_indices = @transform_4, window_bounds = array<i64: 90, 19>}, {pipeline_mode = #tpu.pipeline_mode<synchronous>, transform_indices = @transform_5, window_bounds = array<i64: 5, 32>}, {pipeline_mode = #tpu.pipeline_mode<synchronous>, transform_indices = @transform_6, window_bounds = array<i64: 1, 32>}, {pipeline_mode = #tpu.pipeline_mode<synchronous>, transform_indices = @transform_7, window_bounds = array<i64: 32, 32>}, {pipeline_mode = #tpu.pipeline_mode<synchronous>, transform_indices = @transform_8, window_bounds = array<i64: 1, 32>}, {pipeline_mode = #tpu.pipeline_mode<synchronous>, transform_indices = @transform_9, window_bounds = array<i64: 32, 10>}, {pipeline_mode = #tpu.pipeline_mode<synchronous>, transform_indices = @transform_10, window_bounds = array<i64: 1, 10>}, {transform_indices = @transform_11, window_bounds = array<i64: 64, 19>}]} {
    %c0 = arith.constant 0 : index
    %c0_0 = arith.constant 0 : index
    %0 = vector.load %arg1[%c0, %c0_0] : memref<64x5xf32, #tpu.memory_space<vmem>>, vector<64x5xf32>
    %c0_1 = arith.constant 0 : index
    %c0_2 = arith.constant 0 : index
    %1 = vector.load %arg6[%c0_1, %c0_2] : memref<5x32xf32, #tpu.memory_space<vmem>>, vector<5x32xf32>
    %c0_3 = arith.constant 0 : index
    %c0_4 = arith.constant 0 : index
    %2 = vector.load %arg7[%c0_3, %c0_4] : memref<1x32xf32, #tpu.memory_space<vmem>>, vector<1x32xf32>
    %cst = arith.constant dense<0.000000e+00> : vector<64x32xf32>
    %3 = tpu.matmul %0, %1, %cst {dimension_numbers = #tpu.dot_dimension_numbers<[1], [0], [0], [1], [0, 0, 1, 1], [], []>} : vector<64x5xf32>, vector<5x32xf32>, vector<64x32xf32> -> vector<64x32xf32>
    %4 = vector.broadcast %2 : vector<1x32xf32> to vector<64x32xf32>
    %5 = arith.addf %3, %4 : vector<64x32xf32>
    %cst_5 = arith.constant 0.000000e+00 : f32
    %6 = vector.broadcast %cst_5 : f32 to vector<64x32xf32>
    %7 = arith.maximumf %5, %6 : vector<64x32xf32>
    %c0_6 = arith.constant 0 : index
    %c0_7 = arith.constant 0 : index
    %8 = vector.load %arg8[%c0_6, %c0_7] : memref<32x32xf32, #tpu.memory_space<vmem>>, vector<32x32xf32>
    %c0_8 = arith.constant 0 : index
    %c0_9 = arith.constant 0 : index
    %9 = vector.load %arg9[%c0_8, %c0_9] : memref<1x32xf32, #tpu.memory_space<vmem>>, vector<1x32xf32>
    %cst_10 = arith.constant dense<0.000000e+00> : vector<64x32xf32>
    %10 = tpu.matmul %7, %8, %cst_10 {dimension_numbers = #tpu.dot_dimension_numbers<[1], [0], [0], [1], [0, 0, 1, 1], [], []>} : vector<64x32xf32>, vector<32x32xf32>, vector<64x32xf32> -> vector<64x32xf32>
    %11 = vector.broadcast %9 : vector<1x32xf32> to vector<64x32xf32>
    %12 = arith.addf %10, %11 : vector<64x32xf32>
    %cst_11 = arith.constant 0.000000e+00 : f32
    %13 = vector.broadcast %cst_11 : f32 to vector<64x32xf32>
    %14 = arith.maximumf %12, %13 : vector<64x32xf32>
    %c0_12 = arith.constant 0 : index
    %c0_13 = arith.constant 0 : index
    %15 = vector.load %arg10[%c0_12, %c0_13] : memref<32x10xf32, #tpu.memory_space<vmem>>, vector<32x10xf32>
    %c0_14 = arith.constant 0 : index
    %c0_15 = arith.constant 0 : index
    %16 = vector.load %arg11[%c0_14, %c0_15] : memref<1x10xf32, #tpu.memory_space<vmem>>, vector<1x10xf32>
    %cst_16 = arith.constant dense<0.000000e+00> : vector<64x10xf32>
    %17 = tpu.matmul %14, %15, %cst_16 {dimension_numbers = #tpu.dot_dimension_numbers<[1], [0], [0], [1], [0, 0, 1, 1], [], []>} : vector<64x32xf32>, vector<32x10xf32>, vector<64x10xf32> -> vector<64x10xf32>
    %18 = vector.broadcast %16 : vector<1x10xf32> to vector<64x10xf32>
    %19 = arith.addf %17, %18 : vector<64x10xf32>
    %c0_17 = arith.constant 0 : index
    %c0_18 = arith.constant 0 : index
    %20 = vector.load %arg3[%c0_17, %c0_18] : memref<10x90xf32, #tpu.memory_space<vmem>>, vector<10x90xf32>
    %cst_19 = arith.constant dense<0.000000e+00> : vector<64x90xf32>
    %21 = tpu.matmul %19, %20, %cst_19 {dimension_numbers = #tpu.dot_dimension_numbers<[1], [0], [0], [1], [0, 0, 1, 1], [], []>} : vector<64x10xf32>, vector<10x90xf32>, vector<64x90xf32> -> vector<64x90xf32>
    %c0_20 = arith.constant 0 : index
    %c0_21 = arith.constant 0 : index
    %22 = vector.load %arg2[%c0_20, %c0_21] : memref<64x90xf32, #tpu.memory_space<vmem>>, vector<64x90xf32>
    %23 = arith.mulf %21, %22 : vector<64x90xf32>
    %c0_22 = arith.constant 0 : index
    %c0_23 = arith.constant 0 : index
    %24 = vector.load %arg4[%c0_22, %c0_23] : memref<10x19xf32, #tpu.memory_space<vmem>>, vector<10x19xf32>
    %cst_24 = arith.constant dense<0.000000e+00> : vector<64x19xf32>
    %25 = tpu.matmul %19, %24, %cst_24 {dimension_numbers = #tpu.dot_dimension_numbers<[1], [0], [0], [1], [0, 0, 1, 1], [], []>} : vector<64x10xf32>, vector<10x19xf32>, vector<64x19xf32> -> vector<64x19xf32>
    %c0_25 = arith.constant 0 : index
    %c0_26 = arith.constant 0 : index
    %26 = vector.load %arg5[%c0_25, %c0_26] : memref<90x19xf32, #tpu.memory_space<vmem>>, vector<90x19xf32>
    %cst_27 = arith.constant dense<0.000000e+00> : vector<64x19xf32>
    %27 = tpu.matmul %23, %26, %cst_27 {dimension_numbers = #tpu.dot_dimension_numbers<[1], [0], [0], [1], [0, 0, 1, 1], [], []>} : vector<64x90xf32>, vector<90x19xf32>, vector<64x19xf32> -> vector<64x19xf32>
    %28 = arith.addf %25, %27 : vector<64x19xf32>
    %c0_28 = arith.constant 0 : index
    %c0_29 = arith.constant 0 : index
    %29 = vector.load %arg12[%c0_28, %c0_29] : memref<64x19xf32, #tpu.memory_space<vmem>>, vector<64x19xf32>
    tpu.vector_store %arg12[%c0_28, %c0_29], %28 {strides = array<i32>} : memref<64x19xf32, #tpu.memory_space<vmem>>, vector<64x19xf32>,
    return
  }
  func.func @transform_0(%arg0: i32) -> (i32, i32) {
    %c0_i32 = arith.constant 0 : i32
    %c0_i32_0 = arith.constant 0 : i32
    return %arg0, %c0_i32 : i32, i32
  }
  func.func @transform_1(%arg0: i32) -> (i32, i32) {
    %c0_i32 = arith.constant 0 : i32
    %c0_i32_0 = arith.constant 0 : i32
    return %arg0, %c0_i32 : i32, i32
  }
  func.func @transform_2(%arg0: i32) -> (i32, i32) {
    %c0_i32 = arith.constant 0 : i32
    %c0_i32_0 = arith.constant 0 : i32
    %c0_i32_1 = arith.constant 0 : i32
    return %c0_i32, %c0_i32_0 : i32, i32
  }
  func.func @transform_3(%arg0: i32) -> (i32, i32) {
    %c0_i32 = arith.constant 0 : i32
    %c0_i32_0 = arith.constant 0 : i32
    %c0_i32_1 = arith.constant 0 : i32
    return %c0_i32, %c0_i32_0 : i32, i32
  }
  func.func @transform_4(%arg0: i32) -> (i32, i32) {
    %c0_i32 = arith.constant 0 : i32
    %c0_i32_0 = arith.constant 0 : i32
    %c0_i32_1 = arith.constant 0 : i32
    return %c0_i32, %c0_i32_0 : i32, i32
  }
  func.func @transform_5(%arg0: i32) -> (i32, i32) {
    %c0_i32 = arith.constant 0 : i32
    %c0_i32_0 = arith.constant 0 : i32
    %c0_i32_1 = arith.constant 0 : i32
    return %c0_i32, %c0_i32_0 : i32, i32
  }
  func.func @transform_6(%arg0: i32) -> (i32, i32) {
    %c0_i32 = arith.constant 0 : i32
    %c0_i32_0 = arith.constant 0 : i32
    %c0_i32_1 = arith.constant 0 : i32
    return %c0_i32, %c0_i32_0 : i32, i32
  }
  func.func @transform_7(%arg0: i32) -> (i32, i32) {
    %c0_i32 = arith.constant 0 : i32
    %c0_i32_0 = arith.constant 0 : i32
    %c0_i32_1 = arith.constant 0 : i32
    return %c0_i32, %c0_i32_0 : i32, i32
  }
  func.func @transform_8(%arg0: i32) -> (i32, i32) {
    %c0_i32 = arith.constant 0 : i32
    %c0_i32_0 = arith.constant 0 : i32
    %c0_i32_1 = arith.constant 0 : i32
    return %c0_i32, %c0_i32_0 : i32, i32
  }
  func.func @transform_9(%arg0: i32) -> (i32, i32) {
    %c0_i32 = arith.constant 0 : i32
    %c0_i32_0 = arith.constant 0 : i32
    %c0_i32_1 = arith.constant 0 : i32
    return %c0_i32, %c0_i32_0 : i32, i32
  }
  func.func @transform_10(%arg0: i32) -> (i32, i32) {
    %c0_i32 = arith.constant 0 : i32
    %c0_i32_0 = arith.constant 0 : i32
    %c0_i32_1 = arith.constant 0 : i32
    return %c0_i32, %c0_i32_0 : i32, i32
  }
  func.func @transform_11(%arg0: i32) -> (i32, i32) {
    %c0_i32 = arith.constant 0 : i32
    %c0_i32_0 = arith.constant 0 : i32
    return %arg0, %c0_i32 : i32, i32
  }
}

</mosaic_0001>

<bundles_post_ra>
// kernel: tpu_custom_call.1
= control target key start
LH: loop header
LB: loop body
LE: loop exit
PB: predicated region body
PF: predicated region fallthrough
CT: control target
= control target key end

     0   :  { %vm76_vm0 = vcmask 1044480   ;;  %vm51_vm1 = vcmask 39936   ;;  %vm137_vm2 = vcmask 261120   ;;  %vm311_vm3 = vcmask 1041408   ;;  %s854_s5 = inlined_call_operand.vmem [shape: f32[5,32], index: 5, kind: input, shape index: {}]   ;;  %s855_s0 = inlined_call_operand.vmem [shape: f32[64,5], index: 0, kind: input, shape index: {}]   ;;  %s856_s7 = inlined_call_operand.vmem [shape: f32[32,32], index: 7, kind: input, shape index: {}]   ;;  %s857_s6 = inlined_call_operand.vmem [shape: f32[1,32], index: 6, kind: input, shape index: {}]   ;;  %s858_s8 = inlined_call_operand.vmem [shape: f32[1,32], index: 8, kind: input, shape index: {}]   ;;  %s859_s9 = inlined_call_operand.vmem [shape: f32[32,10], index: 9, kind: input, shape index: {}]   ;;  %s860_s10 = inlined_call_operand.vmem [shape: f32[1,10], index: 10, kind: input, shape index: {}]   ;;  %s861_s2 = inlined_call_operand.vmem [shape: f32[10,90], index: 2, kind: input, shape index: {}]   ;;  %s862_s3 = inlined_call_operand.vmem [shape: f32[10,19], index: 3, kind: input, shape index: {}]   ;;  %s863_s4 = inlined_call_operand.vmem [shape: f32[90,19], index: 4, kind: input, shape index: {}]   ;;  %s864_s1 = inlined_call_operand.vmem [shape: f32[64,90], index: 1, kind: input, shape index: {}]   ;;  %s865_s11 = inlined_call_operand.vmem [shape: f32[64,19], index: 11, kind: output, shape index: {}]  }
   0x1   :  { %v46_v0 = vld [vmem:[%s854_s5] sm:$0x1f]  ;;  %v41_v2 = vld [vmem:[%s855_s0 + $0x18] sm:$0xff]  ;;  %v131_v5 = vld [vmem:[%s856_s7 + $0x10] sm:$0xff]  ;;  %vm286_vm4 = vcmask 80896   ;;  %vm386_vm5 = vcmask 736256  }
   0x2   :  { %v38_v1 = vld [vmem:[%s855_s0] sm:$0xff]  ;;  %512 = vmatpush.msk.msra.mxu0 %vm76_vm0, %v46_v0  ;;  %564 = vmatpush.msk.msra.mxu1 %vm76_vm0, %v46_v0  ;;  %v132_v4 = vld [vmem:[%s856_s7 + $0x18] sm:$0xff]  ;;  %v39_v6 = vld [vmem:[%s855_s0 + $0x8] sm:$0xff]  ;;  %vm499_vm6 = vcmask 154624  }
   0x3   :  { %v42_v3 = vld [vmem:[%s855_s0 + $0x20] sm:$0xff]  ;;  %513 = vmatmul.msk.f32.vlgmr.msra.gmra.mxu0 %vm51_vm1, %v38_v1  ;;  %516 = vmatmul.msk.f32.vlgmr.msra.gmra.mxu1 %vm51_vm1, %v41_v2  ;;  %v43_v7 = vld [vmem:[%s855_s0 + $0x28] sm:$0xff]  ;;  %v40_v8 = vld [vmem:[%s855_s0 + $0x10] sm:$0xff] }
   0x4   :  { %565 = vmatpush.msk.msra.mxu2 %vm76_vm0, %v46_v0  ;;  %174 = vmatpush.msrb.mxu1 %v132_v4  ;;  %v44_v9 = vld [vmem:[%s855_s0 + $0x30] sm:$0xff]  ;;  %v45_v10 = vld [vmem:[%s855_s0 + $0x38] sm:$0xff]  ;;  %v130_v11 = vld [vmem:[%s856_s7 + $0x8] sm:$0xff] }
   0x5   :  { %517 = vmatmul.msk.f32.vlgmr.msra.gmra.mxu2 %vm51_vm1, %v42_v3  ;;  %v129_v12 = vld [vmem:[%s856_s7] sm:$0xff]  ;;  %v214_v28 = vld [vmem:[%s859_s9 + $0x18] sm:$0xff]  ;;  %v213_v29 = vld [vmem:[%s859_s9 + $0x10] sm:$0xff] }
   0x6   :  { %175 = vmatpush.msrb.mxu1 %v131_v5  ;;  %v570_v13 = vld [vmem:[%s857_s6] ss:$0 sm:$0xff]  ;;  %255 = vmatpush.msrb.mxu2 %v214_v28  ;;  %v212_v31 = vld [vmem:[%s859_s9 + $0x8] sm:$0xff]  ;;  %v381_v28 = vld [vmem:[%s863_s4 + $0x38] sm:$0xff] }
   0x7   :  { %v211_v33 = vld [vmem:[%s859_s9] sm:$0xff]  ;;  %v285_v55 = vld [vmem:[%s861_s2 + $0x8] sm:$0x3] }
   0x8   :  { %176 = vmatpush.msrb.mxu1 %v130_v11  ;;  %256 = vmatpush.msrb.mxu2 %v213_v29  ;;  %v571_v42 = vld [vmem:[%s858_s8] ss:$0 sm:$0xff]  ;;  %v380_v29 = vld [vmem:[%s863_s4 + $0x30] sm:$0xff] }
   0x9   :  { %v284_v56 = vld [vmem:[%s861_s2] sm:$0xff]  ;;  %566 = vmatpush.msk.msra.mxu3 %vm311_vm3, %v285_v55 }
   0xa   :  { %177 = vmatpush.msrb.mxu1 %v129_v12  ;;  %257 = vmatpush.msrb.mxu2 %v212_v31  ;;  %v572_v5 = vld [vmem:[%s860_s10] ss:$0 sm:$0xff] }
   0xb   :  { %514 = vmatmul.msk.f32.gmra.mxu0 %vm51_vm1, %v39_v6  ;;  %567 = vmatpush.msra.mxu3 %v284_v56  ;;  %v378_v31 = vld [vmem:[%s863_s4 + $0x20] sm:$0xff] }
   0xc   :  { %258 = vmatpush.msrb.mxu2 %v211_v33  ;;  %537 = vmatpush.msk.msra.mxu1 %vm311_vm3, %v285_v55  ;;  %v376_v33 = vld [vmem:[%s863_s4 + $0x10] sm:$0xff] }
   0xd   :  { %518 = vmatmul.msk.f32.gmra.mxu2 %vm51_vm1, %v43_v7 }
   0xe   :  { %330 = vmatpush.msra.mxu1 %v284_v56 }
  0x13   :  { %515 = vmatmul.msk.f32.gmra.mxu0 %vm51_vm1, %v40_v8 }
  0x15   :  { %519 = vmatmul.msk.f32.gmra.mxu2 %vm51_vm1, %v44_v9 }
  0x1d   :  { %520 = vmatmul.msk.f32.gmra.mxu2 %vm51_vm1, %v45_v10 }
  0x80   :  { %v97_v14 = vpop.f32.mrf.mxu0  ;;  %v106_v22 = vpop.f32.mrf.mxu1 }
  0x81   :  { %v98_v15 = vadd.f32 %v570_v13, %v97_v14  ;;  %v107_v25 = vadd.f32 %v570_v13, %v106_v22  ;;  %v373_v14 = vld [vmem:[%s862_s3 + $0x8] sm:$0x3] }
  0x82   :  { %568 = vmatpush.msk.msrb.mxu3 %vm311_vm3, %v373_v14 }
  0x83   :  { %v121_v16 = vmax.f32 %v98_v15, 0.0  ;;  %v124_v26 = vmax.f32 %v107_v25, 0.0  ;;  %v372_v15 = vld [vmem:[%s862_s3] sm:$0xff]  ;;  %v384_v25 = vld [vmem:[%s863_s4 + $0x50] sm:$0xff] }
  0x84   :  { %569 = vmatpush.msrb.mxu3 %v372_v15 }
  0x85   :  { %521 = vmatmul.msk.f32.vlgmr.msrb.gmra.mxu1 %vm137_vm2, %v121_v16 }
  0x88   :  { %v100_v17 = vpop.f32.mrf.mxu0  ;;  %v109_v24 = vpop.f32.mrf.mxu2 }
  0x89   :  { %v101_v18 = vadd.f32 %v570_v13, %v100_v17  ;;  %v110_v27 = vadd.f32 %v570_v13, %v109_v24  ;;  %v385_v24 = vld [vmem:[%s863_s4 + $0x58] sm:$0x3] }
  0x8a   :  { %546 = vmatpush.msk.msrb.mxu0 %vm311_vm3, %v385_v24 }
  0x8b   :  { %v122_v19 = vmax.f32 %v101_v18, 0.0  ;;  %v125_v32 = vmax.f32 %v110_v27, 0.0  ;;  %v382_v27 = vld [vmem:[%s863_s4 + $0x40] sm:$0xff] }
  0x8c   :  { %419 = vmatpush.msrb.mxu0 %v384_v25 }
  0x8d   :  { %522 = vmatmul.msk.f32.gmra.mxu1 %vm137_vm2, %v122_v19 }
  0x90   :  { %v103_v20 = vpop.f32.mrf.mxu0  ;;  %v112_v30 = vpop.f32.mrf.mxu2 }
  0x91   :  { %v104_v21 = vadd.f32 %v570_v13, %v103_v20  ;;  %v113_v34 = vadd.f32 %v570_v13, %v112_v30  ;;  %v379_v30 = vld [vmem:[%s863_s4 + $0x28] sm:$0xff] }
  0x93   :  { %v123_v23 = vmax.f32 %v104_v21, 0.0  ;;  %v126_v36 = vmax.f32 %v113_v34, 0.0  ;;  %v375_v34 = vld [vmem:[%s863_s4 + $0x8] sm:$0xff] }
  0x95   :  { %523 = vmatmul.msk.f32.gmra.mxu1 %vm137_vm2, %v123_v23 }
  0x98   :  { %v115_v35 = vpop.f32.mrf.mxu2 }
  0x99   :  { %v116_v37 = vadd.f32 %v570_v13, %v115_v35  ;;  %v374_v35 = vld [vmem:[%s863_s4] sm:$0xff] }
  0x9b   :  { %v127_v38 = vmax.f32 %v116_v37, 0.0 }
  0x9d   :  { %524 = vmatmul.msk.f32.gmra.mxu1 %vm137_vm2, %v124_v26  ;;  %v383_v26 = vld [vmem:[%s863_s4 + $0x48] sm:$0xff] }
  0x9e   :  { %420 = vmatpush.msrb.mxu0 %v383_v26 }
  0xa0   :  { %v118_v39 = vpop.f32.mrf.mxu2  ;;  %421 = vmatpush.msrb.mxu0 %v382_v27 }
  0xa1   :  { %v119_v40 = vadd.f32 %v570_v13, %v118_v39  ;;  %v357_v39 = vld [vmem:[%s864_s1 + $0x8] sm:$0xff] }
  0xa2   :  { %422 = vmatpush.msrb.mxu0 %v381_v28 }
  0xa3   :  { %v128_v41 = vmax.f32 %v119_v40, 0.0 }
  0xa4   :  { %423 = vmatpush.msrb.mxu0 %v380_v29 }
  0xa5   :  { %525 = vmatmul.msk.f32.gmra.mxu1 %vm137_vm2, %v125_v32  ;;  %v377_v32 = vld [vmem:[%s863_s4 + $0x18] sm:$0xff] }
  0xa6   :  { %424 = vmatpush.msrb.mxu0 %v379_v30 }
  0xa8   :  { %425 = vmatpush.msrb.mxu0 %v378_v31 }
  0xaa   :  { %426 = vmatpush.msrb.mxu0 %v377_v32 }
  0xac   :  { %427 = vmatpush.msrb.mxu0 %v376_v33 }
  0xad   :  { %526 = vmatmul.msk.f32.gmra.mxu1 %vm137_vm2, %v126_v36  ;;  %v356_v36 = vld [vmem:[%s864_s1] sm:$0xff] }
  0xae   :  { %428 = vmatpush.msrb.mxu0 %v375_v34 }
  0xb0   :  { %429 = vmatpush.msrb.mxu0 %v374_v35 }
  0xb2   :  { %555 = vmatpush.msk.msra.mxu0 %vm311_vm3, %v373_v14 }
  0xb4   :  { %473 = vmatpush.msra.mxu0 %v372_v15 }
  0xb5   :  { %527 = vmatmul.msk.f32.gmra.mxu1 %vm137_vm2, %v127_v38 }
  0xbd   :  { %528 = vmatmul.msk.f32.gmra.mxu1 %vm137_vm2, %v128_v41 }
 0x102   :  { %v179_v43 = vpop.f32.mrf.mxu1 }
 0x103   :  { %v180_v44 = vadd.f32 %v571_v42, %v179_v43 }
 0x105   :  { %v203_v45 = vmax.f32 %v180_v44, 0.0 }
 0x107   :  { %529 = vmatmul.msk.f32.vlgmr.msrb.gmra.mxu2 %vm137_vm2, %v203_v45  ;;  %v359_v45 = vld [vmem:[%s864_s1 + $0x18] sm:$0xff] }
 0x10a   :  { %v182_v46 = vpop.f32.mrf.mxu1 }
 0x10b   :  { %v183_v47 = vadd.f32 %v571_v42, %v182_v46 }
 0x10d   :  { %v204_v48 = vmax.f32 %v183_v47, 0.0 }
 0x10f   :  { %530 = vmatmul.msk.f32.gmra.mxu2 %vm137_vm2, %v204_v48  ;;  %v360_v48 = vld [vmem:[%s864_s1 + $0x20] sm:$0xff] }
 0x112   :  { %v185_v49 = vpop.f32.mrf.mxu1 }
 0x113   :  { %v186_v50 = vadd.f32 %v571_v42, %v185_v49 }
 0x115   :  { %v205_v51 = vmax.f32 %v186_v50, 0.0 }
 0x117   :  { %531 = vmatmul.msk.f32.gmra.mxu2 %vm137_vm2, %v205_v51  ;;  %v361_v51 = vld [vmem:[%s864_s1 + $0x28] sm:$0xff] }
 0x11a   :  { %v188_v52 = vpop.f32.mrf.mxu1 }
 0x11b   :  { %v189_v53 = vadd.f32 %v571_v42, %v188_v52 }
 0x11d   :  { %v206_v54 = vmax.f32 %v189_v53, 0.0 }
 0x11f   :  { %532 = vmatmul.msk.f32.gmra.mxu2 %vm137_vm2, %v206_v54  ;;  %v362_v54 = vld [vmem:[%s864_s1 + $0x30] sm:$0xff] }
 0x122   :  { %v191_v57 = vpop.f32.mrf.mxu1 }
 0x123   :  { %v192_v58 = vadd.f32 %v571_v42, %v191_v57  ;;  %v363_v57 = vld [vmem:[%s864_s1 + $0x38] sm:$0xff] }
 0x125   :  { %v207_v59 = vmax.f32 %v192_v58, 0.0 }
 0x127   :  { %533 = vmatmul.msk.f32.gmra.mxu2 %vm137_vm2, %v207_v59 }
 0x12a   :  { %v194_v60 = vpop.f32.mrf.mxu1 }
 0x12b   :  { %v195_v61 = vadd.f32 %v571_v42, %v194_v60 }
 0x12d   :  { %v208_v62 = vmax.f32 %v195_v61, 0.0 }
 0x12f   :  { %534 = vmatmul.msk.f32.gmra.mxu2 %vm137_vm2, %v208_v62 }
 0x132   :  { %v197_v63 = vpop.f32.mrf.mxu1 }
 0x133   :  { %v198_v0 = vadd.f32 %v571_v42, %v197_v63 }
 0x135   :  { %v209_v1 = vmax.f32 %v198_v0, 0.0 }
 0x137   :  { %535 = vmatmul.msk.f32.gmra.mxu2 %vm137_vm2, %v209_v1 }
 0x13a   :  { %v200_v2 = vpop.f32.mrf.mxu1 }
 0x13b   :  { %v201_v3 = vadd.f32 %v571_v42, %v200_v2  ;;  %v358_v42 = vld [vmem:[%s864_s1 + $0x10] sm:$0xff] }
 0x13d   :  { %v210_v4 = vmax.f32 %v201_v3, 0.0 }
 0x13f   :  { %536 = vmatmul.msk.f32.gmra.mxu2 %vm137_vm2, %v210_v4 }
 0x18a   :  { %v260_v6 = vpop.f32.mrf.mxu2 }
 0x18b   :  { %v725_v7 = vadd.f32 %v572_v5, %v260_v6 }
 0x18d   :  { %538 = vmatmul.msk.f32.vlgmr.msra.gmra.mxu1 %vm286_vm4, %v725_v7 }
 0x192   :  { %v263_v8 = vpop.f32.mrf.mxu2 }
 0x193   :  { %v264_v9 = vadd.f32 %v572_v5, %v263_v8 }
 0x195   :  { %539 = vmatmul.msk.f32.gmra.mxu1 %vm286_vm4, %v264_v9 }
 0x19a   :  { %v266_v10 = vpop.f32.mrf.mxu2 }
 0x19b   :  { %v267_v11 = vadd.f32 %v572_v5, %v266_v10 }
 0x19d   :  { %540 = vmatmul.msk.f32.gmra.mxu1 %vm286_vm4, %v267_v11 }
 0x1a2   :  { %v269_v12 = vpop.f32.mrf.mxu2 }
 0x1a3   :  { %v270_v13 = vadd.f32 %v572_v5, %v269_v12 }
 0x1a5   :  { %541 = vmatmul.msk.f32.vlgmr.msra.gmra.mxu3 %vm286_vm4, %v270_v13 }
 0x1aa   :  { %v272_v16 = vpop.f32.mrf.mxu2 }
 0x1ab   :  { %v273_v17 = vadd.f32 %v572_v5, %v272_v16 }
 0x1ad   :  { %542 = vmatmul.msk.f32.gmra.mxu3 %vm286_vm4, %v273_v17 }
 0x1b2   :  { %v275_v18 = vpop.f32.mrf.mxu2 }
 0x1b3   :  { %v276_v19 = vadd.f32 %v572_v5, %v275_v18 }
 0x1b5   :  { %543 = vmatmul.msk.f32.gmra.mxu3 %vm286_vm4, %v276_v19 }
 0x1ba   :  { %v278_v20 = vpop.f32.mrf.mxu2 }
 0x1bb   :  { %v279_v21 = vadd.f32 %v572_v5, %v278_v20 }
 0x1bd   :  { %544 = vmatmul.msk.f32.gmra.mxu3 %vm286_vm4, %v279_v21 }
 0x1c2   :  { %v281_v22 = vpop.f32.mrf.mxu2 }
 0x1c3   :  { %v282_v23 = vadd.f32 %v572_v5, %v281_v22 }
 0x1c5   :  { %545 = vmatmul.msk.f32.gmra.mxu3 %vm286_vm4, %v282_v23 }
 0x1cd   :  { %557 = vmatmul.msk.f32.vlgmr.msrb.gmra.mxu3 %vm286_vm4, %v264_v9 }
 0x1d5   :  { %558 = vmatmul.msk.f32.gmra.mxu3 %vm286_vm4, %v267_v11 }
 0x1dd   :  { %559 = vmatmul.msk.f32.gmra.mxu3 %vm286_vm4, %v270_v13 }
 0x1e5   :  { %560 = vmatmul.msk.f32.gmra.mxu3 %vm286_vm4, %v273_v17 }
 0x1ed   :  { %561 = vmatmul.msk.f32.gmra.mxu3 %vm286_vm4, %v276_v19 }
 0x1f5   :  { %562 = vmatmul.msk.f32.gmra.mxu3 %vm286_vm4, %v279_v21 }
 0x1fd   :  { %563 = vmatmul.msk.f32.gmra.mxu3 %vm286_vm4, %v282_v23 }
 0x20a   :  { %v332_v37 = vpop.f32.mrf.mxu1 }
 0x20b   :  { %v364_v38 = vmul.f32 %v356_v36, %v332_v37 }
 0x20d   :  { %547 = vmatmul.msk.f32.vlgmr.msrb.gmra.mxu0 %vm386_vm5, %v364_v38 }
 0x212   :  { %v335_v40 = vpop.f32.mrf.mxu1 }
 0x213   :  { %v365_v41 = vmul.f32 %v357_v39, %v335_v40 }
 0x215   :  { %548 = vmatmul.msk.f32.gmra.mxu0 %vm386_vm5, %v365_v41 }
 0x21a   :  { %v338_v43 = vpop.f32.mrf.mxu1 }
 0x21b   :  { %v366_v44 = vmul.f32 %v358_v42, %v338_v43 }
 0x21d   :  { %549 = vmatmul.msk.f32.gmra.mxu0 %vm386_vm5, %v366_v44 }
 0x228   :  { %v341_v46 = vpop.f32.mrf.mxu3 }
 0x229   :  { %v367_v47 = vmul.f32 %v359_v45, %v341_v46 }
 0x22b   :  { %550 = vmatmul.msk.f32.gmra.mxu0 %vm386_vm5, %v367_v47 }
 0x230   :  { %v344_v49 = vpop.f32.mrf.mxu3 }
 0x231   :  { %v368_v50 = vmul.f32 %v360_v48, %v344_v49 }
 0x233   :  { %551 = vmatmul.msk.f32.gmra.mxu0 %vm386_vm5, %v368_v50 }
 0x238   :  { %v347_v52 = vpop.f32.mrf.mxu3 }
 0x239   :  { %v369_v53 = vmul.f32 %v361_v51, %v347_v52 }
 0x23b   :  { %552 = vmatmul.msk.f32.gmra.mxu0 %vm386_vm5, %v369_v53 }
 0x240   :  { %v350_v55 = vpop.f32.mrf.mxu3 }
 0x241   :  { %v370_v56 = vmul.f32 %v362_v54, %v350_v55 }
 0x243   :  { %553 = vmatmul.msk.f32.gmra.mxu0 %vm386_vm5, %v370_v56 }
 0x248   :  { %v353_v58 = vpop.f32.mrf.mxu3 }
 0x249   :  { %v371_v59 = vmul.f32 %v363_v57, %v353_v58 }
 0x24b   :  { %554 = vmatmul.msk.f32.gmra.mxu0 %vm386_vm5, %v371_v59 }
 0x250   :  { %v478_v61 = vpop.f32.mrf.mxu3 }
 0x253   :  { %556 = vmatmul.msk.f32.vlgmr.msra.gmra.mxu0 %vm286_vm4, %v725_v7 }
 0x258   :  { %v481_v0 = vpop.f32.mrf.mxu3 }
 0x260   :  { %v484_v3 = vpop.f32.mrf.mxu3 }
 0x268   :  { %v487_v6 = vpop.f32.mrf.mxu3 }
 0x270   :  { %v490_v9 = vpop.f32.mrf.mxu3 }
 0x278   :  { %v493_v12 = vpop.f32.mrf.mxu3 }
 0x280   :  { %v496_v15 = vpop.f32.mrf.mxu3 }
 0x28a   :  { %v431_v60 = vpop.f32.mrf.mxu0 }
 0x292   :  { %v434_v62 = vpop.f32.mrf.mxu0 }
 0x293   :  { %v479_v63 = vadd.f32 %v478_v61, %v434_v62 }
 0x295   :  { %501 = vst.msk [vmem:[%s865_s11 + $0x8] sm:$0xff] %vm499_vm6, %v479_v63 }
 0x29a   :  { %v437_v1 = vpop.f32.mrf.mxu0 }
 0x29b   :  { %v482_v2 = vadd.f32 %v481_v0, %v437_v1 }
 0x29d   :  { %502 = vst.msk [vmem:[%s865_s11 + $0x10] sm:$0xff] %vm499_vm6, %v482_v2 }
 0x2a8   :  { %v440_v4 = vpop.f32.mrf.mxu0 }
 0x2a9   :  { %v485_v5 = vadd.f32 %v484_v3, %v440_v4 }
 0x2ab   :  { %503 = vst.msk [vmem:[%s865_s11 + $0x18] sm:$0xff] %vm499_vm6, %v485_v5 }
 0x2b0   :  { %v443_v7 = vpop.f32.mrf.mxu0 }
 0x2b1   :  { %v488_v8 = vadd.f32 %v487_v6, %v443_v7 }
 0x2b3   :  { %504 = vst.msk [vmem:[%s865_s11 + $0x20] sm:$0xff] %vm499_vm6, %v488_v8 }
 0x2b8   :  { %v446_v10 = vpop.f32.mrf.mxu0 }
 0x2b9   :  { %v491_v11 = vadd.f32 %v490_v9, %v446_v10 }
 0x2bb   :  { %505 = vst.msk [vmem:[%s865_s11 + $0x28] sm:$0xff] %vm499_vm6, %v491_v11 }
 0x2c0   :  { %v449_v13 = vpop.f32.mrf.mxu0 }
 0x2c1   :  { %v494_v14 = vadd.f32 %v493_v12, %v449_v13 }
 0x2c3   :  { %506 = vst.msk [vmem:[%s865_s11 + $0x30] sm:$0xff] %vm499_vm6, %v494_v14 }
 0x2c8   :  { %v452_v16 = vpop.f32.mrf.mxu0 }
 0x2c9   :  { %v497_v17 = vadd.f32 %v496_v15, %v452_v16 }
 0x2cb   :  { %507 = vst.msk [vmem:[%s865_s11 + $0x38] sm:$0xff] %vm499_vm6, %v497_v17 }
 0x2d0   :  { %v475_v18 = vpop.f32.mrf.mxu0 }
 0x2d1   :  { %v476_v19 = vadd.f32 %v475_v18, %v431_v60 }
 0x2d3   :  { %500 = vst.msk [vmem:[%s865_s11] sm:$0xff] %vm499_vm6, %v476_v19 }

</bundles_post_ra>
